<compile_context>
chip_gen: v5e
topology: v5e:2x2
jax: 0.10.0
libtpu: 0.0.40
codegen_flags: <defaults>
</compile_context>

<pallas_src>
import jax
import jax.numpy as jnp
from jax.experimental import pallas as pl
from jax.experimental.pallas import tpu as pltpu


def _bilinear_weight(in_size: int, out_size: int) -> jnp.ndarray:
    """(out_size, in_size) matrix W s.t. W @ v == 1-D bilinear resize of v
    with align_corners=True semantics (matches F.interpolate)."""
    if in_size == 1:
        return jnp.ones((out_size, 1), jnp.float32)
    src = jnp.arange(out_size, dtype=jnp.float32) * (in_size - 1) / (out_size - 1)
    i0 = jnp.clip(jnp.floor(src).astype(jnp.int32), 0, in_size - 2)
    frac = src - i0.astype(jnp.float32)
    rows = jnp.arange(out_size)
    w = jnp.zeros((out_size, in_size), jnp.float32)
    w = w.at[rows, i0].add(1.0 - frac)
    w = w.at[rows, i0 + 1].add(frac)
    return w


def _upsample_kernel(x_ref, wh_ref, ww_ref, o_ref):
    # x_ref:  (Cb, H,  W)    in x.dtype
    # wh_ref: (Ho, H)        in x.dtype
    # ww_ref: (W,  Wo)       in x.dtype
    # o_ref:  (Cb, Ho, Wo)
    cb, h, w = x_ref.shape
    ho, wo = o_ref.shape[1], o_ref.shape[2]

    x = x_ref[...]                                   # (Cb, H, W), native dtype
    # --- W interpolation: one large 2-D MXU matmul, M = Cb*H ---
    x2 = x.reshape(cb * h, w)                        # leading-dim collapse (cheap)
    tmp = jnp.dot(x2, ww_ref[...],
                  preferred_element_type=jnp.float32)        # (Cb*H, Wo) f32 acc
    tmp = tmp.reshape(cb, h, wo).astype(x.dtype)              # back to native dtype

    # --- H interpolation: batched matmul (flash-attn style 'bij,bjk->bik') ---
    wh_b = jnp.broadcast_to(wh_ref[...], (cb, ho, h))         # (Cb, Ho, H)
    out = jnp.einsum('coh,chv->cov', wh_b, tmp,
                     preferred_element_type=jnp.float32)      # (Cb, Ho, Wo)

    o_ref[...] = out.astype(o_ref.dtype)


def upsample_bilinear_2x(x: jnp.ndarray) -> jnp.ndarray:
    """Bilinear 2x upsample, align_corners=True, NCHW layout."""
    N, C, H, W = x.shape
    Ho, Wo = 2 * H, 2 * W
    NC = N * C
    dtype = x.dtype

    # Interpolation matrices in the input dtype -> MXU-native matmuls (f32 accumulate).
    wh = _bilinear_weight(H, Ho).astype(dtype)       # (Ho, H)
    ww = _bilinear_weight(W, Wo).T.astype(dtype)     # (W, Wo)

    xf = x.reshape(NC, H, W)

    # ---- choose channels-per-block Cb ----
    itemsize = jnp.dtype(dtype).itemsize
    # double-buffered in + out block bytes per fused channel
    per_ch = (H * W + Ho * Wo) * itemsize * 2
    vmem_budget = 24 * 1024 * 1024                   # stay well under 32 MiB scoped default
    cb_vmem = max(1, vmem_budget // max(per_ch, 1))
    cb_mxu = max(1, (256 + H - 1) // H)              # aim for M = Cb*H >= 256
    Cb = int(min(NC, cb_vmem, cb_mxu))
    # keep >= 2 grid steps so the "parallel" axis can shard across v7x's 2 TensorCores
    if NC >= 2 and (NC + Cb - 1) // Cb < 2:
        Cb = (NC + 1) // 2
    Cb = max(1, min(Cb, NC))

    G = pl.cdiv(NC, Cb)
    NCp = G * Cb
    if NCp != NC:
        xf = jnp.pad(xf, ((0, NCp - NC), (0, 0), (0, 0)))

    out = pl.pallas_call(
        _upsample_kernel,
        out_shape=jax.ShapeDtypeStruct((NCp, Ho, Wo), dtype),
        grid_spec=pltpu.PrefetchScalarGridSpec(
            num_scalar_prefetch=0,
            grid=(G,),
            in_specs=[
                pl.BlockSpec((Cb, H, W), lambda g: (g, 0, 0)),
                pl.BlockSpec((Ho, H), lambda g: (0, 0)),
                pl.BlockSpec((W, Wo), lambda g: (0, 0)),
            ],
            out_specs=pl.BlockSpec((Cb, Ho, Wo), lambda g: (g, 0, 0)),
        ),
        compiler_params=pltpu.CompilerParams(
            dimension_semantics=("parallel",)),
    )(xf, wh, ww)

    return out[:NC].reshape(N, C, Ho, Wo)


def _reference_upsample(x: jnp.ndarray) -> jnp.ndarray:
    """Pure-JAX gather-based reference for F.interpolate(scale=2, bilinear,
    align_corners=True)."""
    N, C, H, W = x.shape
    Ho, Wo = 2 * H, 2 * W

    def coords(in_size, out_size):
        if in_size == 1:
            return (jnp.zeros(out_size, jnp.int32),
                    jnp.zeros(out_size, jnp.int32),
                    jnp.zeros(out_size, jnp.float32))
        src = jnp.arange(out_size, dtype=jnp.float32) * (in_size - 1) / (out_size - 1)
        i0 = jnp.clip(jnp.floor(src).astype(jnp.int32), 0, in_size - 2)
        return i0, i0 + 1, src - i0.astype(jnp.float32)

    h0, h1, hf = coords(H, Ho)
    w0, w1, wf = coords(W, Wo)
    hf = hf[:, None]
    wf = wf[None, :]

    top = x[:, :, h0, :]
    bot = x[:, :, h1, :]
    rows = top * (1.0 - hf)[None, None] + bot * hf[None, None]
    left = rows[:, :, :, w0]
    right = rows[:, :, :, w1]
    return left * (1.0 - wf)[None, None] + right * wf[None, None]


if __name__ == "__main__":
    key = jax.random.PRNGKey(0)
    x = jax.random.normal(key, (2, 4, 16, 16), dtype=jnp.float32)

    out = upsample_bilinear_2x(x)
    out = jax.block_until_ready(out)

    ref = _reference_upsample(x)
    assert out.shape == (2, 4, 32, 32), out.shape
    assert jnp.allclose(out, ref, atol=1e-5, rtol=1e-5), "mismatch vs reference"

    print("KERNEL_OK")
</pallas_src>

<mosaic_0001>
module attributes {stable_mosaic.version = 11 : i64} {
  func.func @_upsample_kernel(%arg0: i32, %arg1: memref<4x16x16xf32, #tpu.memory_space<vmem>>, %arg2: memref<32x16xf32, #tpu.memory_space<vmem>>, %arg3: memref<16x32xf32, #tpu.memory_space<vmem>>, %arg4: memref<4x32x32xf32, #tpu.memory_space<vmem>>) attributes {dimension_semantics = [#tpu.dimension_semantics<parallel>], iteration_bounds = array<i64: 2>, scalar_prefetch = 0 : i64, scratch_operands = 0 : i64, tpu.core_type = #tpu.core_type<tc>, window_params = [{transform_indices = @transform_0, window_bounds = array<i64: 4, 16, 16>}, {pipeline_mode = #tpu.pipeline_mode<synchronous>, transform_indices = @transform_1, window_bounds = array<i64: 32, 16>}, {pipeline_mode = #tpu.pipeline_mode<synchronous>, transform_indices = @transform_2, window_bounds = array<i64: 16, 32>}, {transform_indices = @transform_3, window_bounds = array<i64: 4, 32, 32>}]} {
    %c0 = arith.constant 0 : index
    %c0_0 = arith.constant 0 : index
    %c0_1 = arith.constant 0 : index
    %0 = vector.load %arg1[%c0, %c0_0, %c0_1] : memref<4x16x16xf32, #tpu.memory_space<vmem>>, vector<4x16x16xf32>
    %1 = vector.shape_cast %0 : vector<4x16x16xf32> to vector<64x16xf32>
    %c0_2 = arith.constant 0 : index
    %c0_3 = arith.constant 0 : index
    %2 = vector.load %arg3[%c0_2, %c0_3] : memref<16x32xf32, #tpu.memory_space<vmem>>, vector<16x32xf32>
    %cst = arith.constant dense<0.000000e+00> : vector<64x32xf32>
    %3 = tpu.matmul %1, %2, %cst {dimension_numbers = #tpu.dot_dimension_numbers<[1], [0], [0], [1], [0, 0, 1, 1], [], []>} : vector<64x16xf32>, vector<16x32xf32>, vector<64x32xf32> -> vector<64x32xf32>
    %4 = vector.shape_cast %3 : vector<64x32xf32> to vector<4x16x32xf32>
    %c0_4 = arith.constant 0 : index
    %c0_5 = arith.constant 0 : index
    %5 = vector.load %arg2[%c0_4, %c0_5] : memref<32x16xf32, #tpu.memory_space<vmem>>, vector<32x16xf32>
    %6 = vector.shape_cast %5 : vector<32x16xf32> to vector<1x32x16xf32>
    %7 = vector.broadcast %6 : vector<1x32x16xf32> to vector<4x32x16xf32>
    "tpu.trace_start"() <{level = 10 : i32, message = "coh,chv->cov"}> : () -> ()
    %cst_6 = arith.constant dense<0.000000e+00> : vector<4x32x32xf32>
    %8 = tpu.matmul %7, %4, %cst_6 {dimension_numbers = #tpu.dot_dimension_numbers<[2], [1], [1], [2], [0, 0, 0, 1, 1, 2], [0], [0]>} : vector<4x32x16xf32>, vector<4x16x32xf32>, vector<4x32x32xf32> -> vector<4x32x32xf32>
    "tpu.trace_stop"() : () -> ()
    %c0_7 = arith.constant 0 : index
    %c0_8 = arith.constant 0 : index
    %c0_9 = arith.constant 0 : index
    %9 = vector.load %arg4[%c0_7, %c0_8, %c0_9] : memref<4x32x32xf32, #tpu.memory_space<vmem>>, vector<4x32x32xf32>
    tpu.vector_store %arg4[%c0_7, %c0_8, %c0_9], %8 {strides = array<i32>} : memref<4x32x32xf32, #tpu.memory_space<vmem>>, vector<4x32x32xf32>,
    return
  }
  func.func @transform_0(%arg0: i32) -> (i32, i32, i32) {
    %c0_i32 = arith.constant 0 : i32
    %c0_i32_0 = arith.constant 0 : i32
    %c0_i32_1 = arith.constant 0 : i32
    return %arg0, %c0_i32, %c0_i32_0 : i32, i32, i32
  }
  func.func @transform_1(%arg0: i32) -> (i32, i32) {
    %c0_i32 = arith.constant 0 : i32
    %c0_i32_0 = arith.constant 0 : i32
    %c0_i32_1 = arith.constant 0 : i32
    return %c0_i32, %c0_i32_0 : i32, i32
  }
  func.func @transform_2(%arg0: i32) -> (i32, i32) {
    %c0_i32 = arith.constant 0 : i32
    %c0_i32_0 = arith.constant 0 : i32
    %c0_i32_1 = arith.constant 0 : i32
    return %c0_i32, %c0_i32_0 : i32, i32
  }
  func.func @transform_3(%arg0: i32) -> (i32, i32, i32) {
    %c0_i32 = arith.constant 0 : i32
    %c0_i32_0 = arith.constant 0 : i32
    %c0_i32_1 = arith.constant 0 : i32
    return %arg0, %c0_i32, %c0_i32_0 : i32, i32, i32
  }
}

</mosaic_0001>

<bundles_post_ra>
// kernel: tpu_custom_call.1
= control target key start
LH: loop header
LB: loop body
LE: loop exit
PB: predicated region body
PF: predicated region fallthrough
CT: control target
= control target key end

     0   :  { %8 = vsyncpa [#allocation3], 0  ;;  %s934_s0 = inlined_call_operand.hbm [shape: f32[8,16,16], index: 0, kind: input, shape index: {}]   ;;  %s935_s1 = inlined_call_operand.vmem [shape: f32[32,16], index: 1, kind: input, shape index: {}]   ;;  %s936_s2 = inlined_call_operand.vmem [shape: f32[16,32], index: 2, kind: input, shape index: {}]   ;;  %s937_s3 = inlined_call_operand.hbm [shape: f32[8,32,32], index: 3, kind: output, shape index: {}]  }
   0x1   :  { %10 = vsyncpa [#allocation3 + $0x1], 0 }
   0x2   :  { %11 = vsyncpa [#allocation4], 0 }
   0x3   :  { %13 = vsyncpa [#allocation4 + $0x1], 0  ;;  %s729_s12 = smov 0   ;;  %s731_s13 = smov 0  }
   0x4   :  { %s733_s14 = smov 0   ;;  %s735_s15 = smov 0  }
   0x5 LB: > { %s750_s16 = sadd.s32 4294967295, %s703_s15   ;;  %s509_s17 = sadd.s32 4294967294, %s703_s15   ;;  %s703_s15 = sphi %s735_s15, %s947_s15   ;;  %s699_s14 = sphi %s733_s14, %s946_s14   ;;  %s695_s13 = sphi %s731_s13, %s945_s13   ;;  %s691_s12 = sphi %s729_s12, %s944_s12  }
   0x6   : > { %s754_s18 = sadd.s32 1, %s703_s15   ;;  %s26_s19 = sadd.s32 1, %s699_s14 }
   0x7   : > { %s23_s20 = ssub.s32 %s703_s15, %s754_s18  ;;  %p33_p0 = scmp.ne.s32.totalorder %s699_s14, %s695_s13 }
   0x8   : > { %p24_p1 = scmp.eq.s32.totalorder %s23_s20, 0  ;;  %p34_p2 = scmp.eq.s32.totalorder %s703_s15, 0 }
   0x9   : > { %p39_p3 = scmp.ne.s32.totalorder %s695_s13, %s691_s12  ;;  %p40_p4 = scmp.eq.s32.totalorder %s750_s16, 0 }
   0xa   : > { %s766_s21 = scalar_select %p24_p1, %s699_s14, %s26_s19  }
   0xb   : > { %p768_p5 = por %p34_p2, %p33_p0  ;;  %p772_p6 = por %p40_p4, %p39_p3 }
   0xc   : > { %p105_p7 = scmp.eq.s32.totalorder %s750_s16, 1  ;;  %p111_p8 = scmp.eq.s32.totalorder %s509_s17, 1 }
   0xd   : > { %p569_p10 = scmp.lt.s32.totalorder %s703_s15, 2  ;;  %s137_s26 = sand.u32 1, %s699_s14  }
   0xe   : > { %p779_p11 = por %p105_p7, %p33_p0  ;;  %p783_p12 = por %p111_p8, %p39_p3 }
   0xf   : > { %s550_s27 = sshll.u32 %s703_s15, 6  ;;  %s512_s28 = sshll.u32 %s137_s26, 6 }
  0x10   : > { %s147_s4 = scalar_lea.hbm %s934_s0, %s550_s27  ;;  %s141_s6 = scalar_lea.vmem [#allocation2], %s512_s28 }
  0x11   : > { %s148_s5 = sshll.u32 %s147_s4, 4  ;;  %s150_s7 = sshll.u32 %s141_s6, 4  ;;  %s149_s5 = int_to_ptr.hbm [resolvable:$true] %s148_s5  ;;  %s151_s7 = int_to_ptr.vmem [resolvable:$true] %s150_s7 }
  0x12   : > { %p794_p13 = pnand %p569_p10, %p768_p5  ;;  %p516_p0 = scmp.ge.s32.totalorder %s703_s15, 1 }
  0x13   : > { %p158_p1 = scmp.lt.s32.totalorder %s703_s15, 3  ;;  %s138_s9 = scalar_lea.sflag [#allocation3], %s137_s26 }
  0x14   : > { %s607_s10 = sshra.s32 %s149_s5, 4  ;;  %p611_p3 = pneg %p794_p13  ;;  %s608_s10 = int_to_ptr.hbm [resolvable:$true] %s607_s10 }
  0x15   : > { %s609_s11 = scalar_lea.hbm %s608_s10, 64  ;;  %s614_s20 = scalar_lea.hbm %s934_s0, 128 }
  0x16   : > { %p610_p2 = scmp.ne.s32.totalorder %s608_s10, %s609_s11  ;;  %p615_p5 = scmp.lt.s32.totalorder %s608_s10, %s934_s0 }
  0x17   : > { %p616_p8 = scmp.lt.s32.totalorder %s614_s20, %s609_s11 }
  0x18   : > { %p612_p4 = pnand %p611_p3, %p610_p2 }
  0x19   : > { %p617_p10 = por %p616_p8, %p615_p5 }
  0x1a   : > { %p613_p7 = pneg %p612_p4 }
  0x1c   : > { %p618_p9 = pnand %p617_p10, %p613_p7 }
  0x1e   : > { %621 = shalt.err (!%p618_p9)
}
  0x1f   : > { %s705_s26 = smov 128   ;;  %s706_s28 = smov 8  }
  0x20   : > { %564 = dma.hbm_to_vmem [thread:$0]  (!%p794_p13), %s149_s5, 1024, %s151_s7, %s138_s9, %s705_s26, %s705_s26, %s706_s28  }
  0x21   : > { %p159_p2 = pnand %p516_p0, %p158_p1 }
  0x22   : > { %s815_s29 = sand.u32 (!%p159_p2), 1, %s695_s13  }
  0x23   : > { %162 = sbr.rel (%p159_p2) target bundleno = 374 (0x176), region = 32  ;;  %s517_s30 = sshll.u32 (!%p159_p2), %s815_s29, 6 }
  0x24   : > { %s165_s4 = scalar_lea.sflag (!%p159_p2), [#allocation3], %s815_s29  ;;  %s168_s6 = scalar_lea.vmem (!%p159_p2), [#allocation2], %s517_s30 }
  0x28   : > { %682 = dma.done.wait (%p772_p6), %s165_s4, 1024  }
  0x29   : > { %684 = vsyncadd (%p772_p6), %s165_s4, 4294966272  ;;  %v203_v0 = vld [vmem:[%s936_s2 + $0x8] sm:$0xff]  ;;  %v202_v1 = vld [vmem:[%s936_s2] sm:$0xff]  ;;  %vm204_vm0 = vcmask 130048   ;;  %s518_s26 = sshll.u32 %s815_s29, 7  ;;  %vm402_vm1 = vcmask 261120  }
  0x2a   : > { %243 = vmatpush.msra.mxu0 %v203_v0  ;;  %v194_v2 = vld [vmem:[%s168_s6] sm:$0xff]  ;;  %553 = vmatpush.msra.mxu2 %v203_v0  ;;  %v200_v3 = vld [vmem:[%s168_s6 + $0x30] sm:$0xff]  ;;  %v195_v4 = vld [vmem:[%s168_s6 + $0x8] sm:$0xff]  ;;  %s866_s28 = scalar_lea.vmem [#allocation5], %s518_s26  ;;  %s552_s30 = sshll.u32 %s750_s16, 7 }
  0x2b   : > { %v201_v5 = vld [vmem:[%s168_s6 + $0x38] sm:$0xff]  ;;  %v196_v6 = vld [vmem:[%s168_s6 + $0x10] sm:$0xff]  ;;  %v198_v8 = vld [vmem:[%s168_s6 + $0x20] sm:$0xff]  ;;  %s432_s8 = scalar_lea.hbm %s937_s3, %s552_s30  ;;  %s433_s5 = sshll.u32 %s866_s28, 4  ;;  %s434_s5 = int_to_ptr.vmem [resolvable:$true] %s433_s5 }
  0x2c   : > { %244 = vmatpush.msra.mxu0 %v202_v1  ;;  %554 = vmatpush.msra.mxu2 %v202_v1  ;;  %v197_v7 = vld [vmem:[%s168_s6 + $0x18] sm:$0xff]  ;;  %v199_v9 = vld [vmem:[%s168_s6 + $0x28] sm:$0xff]  ;;  %v272_v13 = vld [vmem:[%s935_s1 + $0x10] sm:$0xff]  ;;  %s435_s7 = sshll.u32 %s432_s8, 4  ;;  %s420_s9 = scalar_lea.sflag [#allocation4], %s815_s29  ;;  %s436_s7 = int_to_ptr.hbm [resolvable:$true] %s435_s7 }
  0x2d   : > { %519 = vmatmul.msk.f32.vlgmr.msra.gmra.mxu0 %vm204_vm0, %v194_v2  ;;  %525 = vmatmul.msk.f32.vlgmr.msra.gmra.mxu2 %vm204_vm0, %v200_v3  ;;  %v270_v14 = vld [vmem:[%s935_s1] sm:$0xff]  ;;  %v273_v17 = vld [vmem:[%s935_s1 + $0x18] sm:$0xff]  ;;  %v271_v18 = vld [vmem:[%s935_s1 + $0x8] sm:$0xff]  ;;  %s651_s23 = sshra.s32 %s436_s7, 4  ;;  %s657_s17 = scalar_lea.hbm %s937_s3, 256  ;;  %s652_s23 = int_to_ptr.hbm [resolvable:$true] %s651_s23 }
  0x2e   : > { %s653_s10 = scalar_lea.hbm %s652_s23, 128  ;;  %p658_p0 = scmp.lt.s32.totalorder %s652_s23, %s937_s3 }
  0x2f   : > { %p654_p6 = scmp.ne.s32.totalorder %s652_s23, %s653_s10  ;;  %p659_p1 = scmp.lt.s32.totalorder %s657_s17, %s653_s10 }
  0x31   : > { %p655_p9 = pnand %p654_p6, %p779_p11  ;;  %p660_p3 = por %p659_p1, %p658_p0 }
  0x33   : > { %p656_p13 = pneg %p655_p9 }
  0x35   : > { %520 = vmatmul.msk.f32.gmra.mxu0 %vm204_vm0, %v195_v4  ;;  %526 = vmatmul.msk.f32.gmra.mxu2 %vm204_vm0, %v201_v5  ;;  %p661_p4 = pnand %p660_p3, %p656_p13 }
  0x3d   : > { %521 = vmatmul.msk.f32.gmra.mxu0 %vm204_vm0, %v196_v6 }
  0x45   : > { %522 = vmatmul.msk.f32.gmra.mxu0 %vm204_vm0, %v197_v7 }
  0x4d   : > { %523 = vmatmul.msk.f32.gmra.mxu0 %vm204_vm0, %v198_v8 }
  0x55   : > { %524 = vmatmul.msk.f32.gmra.mxu0 %vm204_vm0, %v199_v9 }
  0xaa   : > { %v246_v10 = vpop.f32.mrf.mxu0 }
  0xb0   : > { %v264_v11 = vpop.f32.mrf.mxu2 }
  0xb2   : > { %v249_v12 = vpop.f32.mrf.mxu0 }
  0xb3   : > { %300 = vmatpush.msra.mxu1 %v249_v12  ;;  %555 = vmatpush.msra.mxu3 %v249_v12 }
  0xb5   : > { %301 = vmatpush.msra.mxu1 %v246_v10  ;;  %556 = vmatpush.msra.mxu3 %v246_v10 }
  0xb6   : > { %529 = vmatmul.msk.f32.vlgmr.msra.gmra.mxu3 %vm204_vm0, %v272_v13  ;;  %527 = vmatmul.msk.f32.vlgmr.msra.gmra.mxu1 %vm204_vm0, %v270_v14 }
  0xb8   : > { %v267_v15 = vpop.f32.mrf.mxu2 }
  0xb9   : > { %387 = vmatpush.msrb.mxu1 %v267_v15 }
  0xba   : > { %v252_v16 = vpop.f32.mrf.mxu0 }
  0xbb   : > { %388 = vmatpush.msrb.mxu1 %v264_v11 }
  0xbe   : > { %530 = vmatmul.msk.f32.gmra.mxu3 %vm204_vm0, %v273_v17  ;;  %528 = vmatmul.msk.f32.gmra.mxu1 %vm204_vm0, %v271_v18 }
  0xc2   : > { %v255_v19 = vpop.f32.mrf.mxu0 }
  0xc3   : > { %329 = vmatpush.msrb.mxu2 %v255_v19 }
  0xc5   : > { %330 = vmatpush.msrb.mxu2 %v252_v16 }
  0xc6   : > { %531 = vmatmul.msk.f32.vlgmr.msrb.gmra.mxu2 %vm204_vm0, %v270_v14  ;;  %539 = vmatmul.msk.f32.vlgmr.msrb.gmra.mxu1 %vm204_vm0, %v270_v14 }
  0xca   : > { %v258_v20 = vpop.f32.mrf.mxu0 }
  0xce   : > { %532 = vmatmul.msk.f32.gmra.mxu2 %vm204_vm0, %v271_v18  ;;  %540 = vmatmul.msk.f32.gmra.mxu1 %vm204_vm0, %v271_v18 }
  0xd2   : > { %v261_v21 = vpop.f32.mrf.mxu0 }
  0xd3   : > { %358 = vmatpush.msrb.mxu3 %v261_v21 }
  0xd5   : > { %359 = vmatpush.msrb.mxu3 %v258_v20 }
  0xd6   : > { %535 = vmatmul.msk.f32.vlgmr.msrb.gmra.mxu3 %vm204_vm0, %v270_v14  ;;  %533 = vmatmul.msk.f32.gmra.mxu2 %vm204_vm0, %v272_v13 }
  0xd7   : > { %541 = vmatmul.msk.f32.gmra.mxu1 %vm204_vm0, %v272_v13 }
  0xde   : > { %536 = vmatmul.msk.f32.gmra.mxu3 %vm204_vm0, %v271_v18  ;;  %534 = vmatmul.msk.f32.gmra.mxu2 %vm204_vm0, %v273_v17 }
  0xdf   : > { %542 = vmatmul.msk.f32.gmra.mxu1 %vm204_vm0, %v273_v17 }
  0xe6   : > { %537 = vmatmul.msk.f32.gmra.mxu3 %vm204_vm0, %v272_v13 }
  0xee   : > { %538 = vmatmul.msk.f32.gmra.mxu3 %vm204_vm0, %v273_v17 }
 0x133   : > { %v303_v22 = vpop.f32.mrf.mxu1 }
 0x134   : > { %403 = vst.msk [vmem:[%s866_s28] sm:$0xff] %vm402_vm1, %v303_v22 }
 0x139   : > { %v309_v23 = vpop.f32.mrf.mxu3 }
 0x13a   : > { %405 = vst.msk [vmem:[%s866_s28 + $0x10] sm:$0xff] %vm402_vm1, %v309_v23 }
 0x13b   : > { %v306_v24 = vpop.f32.mrf.mxu1 }
 0x13c   : > { %404 = vst.msk [vmem:[%s866_s28 + $0x8] sm:$0xff] %vm402_vm1, %v306_v24 }
 0x141   : > { %v312_v25 = vpop.f32.mrf.mxu3 }
 0x142   : > { %406 = vst.msk [vmem:[%s866_s28 + $0x18] sm:$0xff] %vm402_vm1, %v312_v25 }
 0x143   : > { %v390_v26 = vpop.f32.mrf.mxu1 }
 0x144   : > { %415 = vst.msk [vmem:[%s866_s28 + $0x60] sm:$0xff] %vm402_vm1, %v390_v26 }
 0x149   : > { %v332_v27 = vpop.f32.mrf.mxu2 }
 0x14a   : > { %407 = vst.msk [vmem:[%s866_s28 + $0x20] sm:$0xff] %vm402_vm1, %v332_v27 }
 0x14b   : > { %v393_v28 = vpop.f32.mrf.mxu1 }
 0x14c   : > { %416 = vst.msk [vmem:[%s866_s28 + $0x68] sm:$0xff] %vm402_vm1, %v393_v28 }
 0x151   : > { %v335_v29 = vpop.f32.mrf.mxu2 }
 0x152   : > { %408 = vst.msk [vmem:[%s866_s28 + $0x28] sm:$0xff] %vm402_vm1, %v335_v29 }
 0x154   : > { %v396_v30 = vpop.f32.mrf.mxu1 }
 0x155   : > { %417 = vst.msk [vmem:[%s866_s28 + $0x70] sm:$0xff] %vm402_vm1, %v396_v30 }
 0x159   : > { %v361_v31 = vpop.f32.mrf.mxu3  ;;  %v338_v32 = vpop.f32.mrf.mxu2 }
 0x15a   : > { %411 = vst.msk [vmem:[%s866_s28 + $0x40] sm:$0xff] %vm402_vm1, %v361_v31 }
 0x15b   : > { %409 = vst.msk [vmem:[%s866_s28 + $0x30] sm:$0xff] %vm402_vm1, %v338_v32 }
 0x15c   : > { %v399_v33 = vpop.f32.mrf.mxu1 }
 0x15d   : > { %418 = vst.msk [vmem:[%s866_s28 + $0x78] sm:$0xff] %vm402_vm1, %v399_v33 }
 0x161   : > { %v364_v34 = vpop.f32.mrf.mxu3  ;;  %v341_v35 = vpop.f32.mrf.mxu2 }
 0x162   : > { %412 = vst.msk [vmem:[%s866_s28 + $0x48] sm:$0xff] %vm402_vm1, %v364_v34 }
 0x163   : > { %410 = vst.msk [vmem:[%s866_s28 + $0x38] sm:$0xff] %vm402_vm1, %v341_v35 }
 0x169   : > { %v367_v36 = vpop.f32.mrf.mxu3 }
 0x16a   : > { %413 = vst.msk [vmem:[%s866_s28 + $0x50] sm:$0xff] %vm402_vm1, %v367_v36 }
 0x171   : > { %v370_v37 = vpop.f32.mrf.mxu3 }
 0x172   : > { %414 = vst.msk [vmem:[%s866_s28 + $0x58] sm:$0xff] %vm402_vm1, %v370_v37 }
 0x173   : > { %664 = shalt.err (!%p661_p4)
}
 0x174   : > { %s707_s29 = smov 128   ;;  %s708_s22 = smov 8  }
 0x175   : > { %559 = dma.vmem_to_hbm [thread:$0]  (%p779_p11), %s434_s5, 2048, %s436_s7, %s420_s9, %s707_s29, %s707_s29, %s708_s22  }
 0x176 PF: > { %s450_s27 = sand.u32 1, %s691_s12   ;;  %p943_p7 = scmp.ge.s32.totalorder %s703_s15, 2 }
 0x177   : > { %s451_s26 = scalar_lea.sflag [#allocation4], %s450_s27 }
 0x178   : > { %p566_p5 = pnand %p943_p7, %p783_p12 }
 0x17a   : > { %p567_p8 = pneg %p566_p5 }
 0x17c   : > { %686 = dma.done.wait (%p567_p8), %s451_s26, 2048  }
 0x17d   : > { %688 = vsyncadd (%p567_p8), %s451_s26, 4294965248  ;;  %p16_p10 = scmp.ge.s32.totalorder %s754_s18, 4   ;;  %s944_s12 = smov %s695_s13 }
 0x17e   : > { %s945_s13 = smov %s699_s14  ;;  %s946_s14 = smov %s766_s21 }
 0x17f   : > { %s947_s15 = smov %s754_s18  ;;  %18 = sbr.rel (!%p16_p10) target bundleno = 5 (0x5), region = 77 }
 0x184   :  { %457 = vsyncpa [#allocation3], 1 }
 0x185   :  { %459 = vsyncpa [#allocation3 + $0x1], 1 }
 0x186   :  { %460 = vsyncpa [#allocation4], 1 }
 0x187   :  { %462 = vsyncpa [#allocation4 + $0x1], 1 }

</bundles_post_ra>
